<compile_context>
chip_gen: v6e
topology: v6e:2x2x1
jax: 0.10.0
libtpu: 0.0.40
codegen_flags: <defaults>
</compile_context>

<pallas_src>
import math

import jax
import jax.numpy as jnp
from jax import lax
from jax.experimental import pallas as pl
from jax.experimental.pallas import tpu as pltpu

VOCAB = 64
EMBED_DIM = 32
MAX_SEQ_LEN = 64
N_SEGMENTS = 3
FUSED_ROWS = 128  # VOCAB word rows + 3 segment rows + zero pad -> exactly one MXU pass

# splash-attention style "A @ B^T" contraction (contract last dims of both operands)
NT_DIM_NUMBERS = (((1,), (1,)), ((), ()))


def build_fused_table(word_table, seg_table):
    """Built ONCE (model init), not on the per-call path.

    rows [0, VOCAB)            : word_table * sqrt(D)   (sqrt(D) folded in)
    rows [VOCAB, VOCAB+3)      : seg_table
    rows [VOCAB+3, FUSED_ROWS) : zeros
    """
    V, D = word_table.shape
    fused = jnp.zeros((FUSED_ROWS, D), jnp.float32)
    fused = fused.at[:V].set(word_table.astype(jnp.float32) * math.sqrt(D))
    fused = fused.at[V:V + seg_table.shape[0]].set(seg_table.astype(jnp.float32))
    return fused


def joint_embeddings_kernel(ids_ref, tbl_ref, o_ref):
    S = ids_ref.shape[0]           # n = B * S (= S, since B == 1)
    R, D = tbl_ref.shape           # (128, D)

    wid = ids_ref[:, 0:1]          # (S, 1) token ids, column-oriented
    sid = ids_ref[:, 1:2] + VOCAB  # (S, 1) segment ids offset into the fused table

    # One-hots in (S, 128) orientation: ids broadcast along lanes (no relayout).
    lane = lax.broadcasted_iota(jnp.int32, (S, R), 1)
    oh_w = (lane == wid).astype(jnp.float32)   # word one-hot
    oh_s = (lane == sid).astype(jnp.float32)   # segment one-hot (disjoint row range)
    oh = oh_w + oh_s                           # combined: exactly two ones per row

    # Single 128-deep MXU pass: word*sqrt(D) + segment embedding gathered together.
    # HIGHEST precision keeps the f32 table exact through the one-hot "gather".
    word_seg = jnp.dot(oh, tbl_ref[...],
                       preferred_element_type=jnp.float32,
                       precision=lax.Precision.HIGHEST)            # (S, D)

    # Reference "position embedding": pe is all zeros, so it reduces to adding the raw
    # integer ids broadcast along sublanes (only valid for B == 1, S == D):
    #   out[s, d] += float(x[d]).
    # Extract x as a (1, S) row from the word one-hot via an MXU A@B^T contraction of
    # the lane-index vector against the one-hot -- no vreg transpose, exact for ids<=127.
    vals = lax.broadcasted_iota(jnp.int32, (1, R), 1).astype(jnp.float32)
    pos_row = lax.dot_general(vals, oh_w, NT_DIM_NUMBERS,
                              preferred_element_type=jnp.float32)  # (1, S) == (1, D)

    # TODO(synk): nn.Dropout(0.1) treated as identity (eval mode); PyTorch RNG not reproducible.
    o_ref[...] = word_seg + pos_row            # (S, D) + (1, D) sublane broadcast


def joint_embeddings(x, segment_ids, fused_table):
    """x, segment_ids: (B, S) int32; fused_table: (128, D) f32 (prebuilt once)."""
    B, S = x.shape
    R, D = fused_table.shape
    assert B == 1 and S == D, "reference PositionEmbedding broadcast requires B == 1 and S == embed_dim"

    # Pack both id streams into a single (S, 2) column pair -> one input DMA.
    ids = jnp.concatenate(
        [x.reshape(S, 1).astype(jnp.int32),
         segment_ids.reshape(S, 1).astype(jnp.int32)], axis=1)

    out2d = pl.pallas_call(
        joint_embeddings_kernel,
        out_shape=jax.ShapeDtypeStruct((S, D), jnp.float32),
        in_specs=[
            pl.BlockSpec(memory_space=pltpu.MemorySpace.VMEM),   # packed ids (S, 2)
            pl.BlockSpec(memory_space=pltpu.MemorySpace.VMEM),   # fused table (128, D)
        ],
        out_specs=pl.BlockSpec(memory_space=pltpu.MemorySpace.VMEM),
    )(ids, fused_table)

    # Contiguous row-major -> metadata-only reshape back to (B, S, D).
    return out2d.reshape(B, S, D)


if __name__ == "__main__":
    key = jax.random.PRNGKey(0)
    k1, k2, k3, k4 = jax.random.split(key, 4)
    B, S, D = 1, EMBED_DIM, EMBED_DIM

    # nn.Embedding default init ~ N(0, 1)
    word_table = jax.random.normal(k1, (VOCAB, D), jnp.float32)
    seg_table = jax.random.normal(k2, (N_SEGMENTS, D), jnp.float32)
    # pe buffer is all zeros (the init loop `range(embed_dim, 2)` is empty)
    pe = jnp.zeros((1, MAX_SEQ_LEN, D), jnp.float32)

    x = jax.random.randint(k3, (B, S), 0, VOCAB, dtype=jnp.int32)
    segment_ids = jax.random.randint(k4, (B, S), 0, N_SEGMENTS, dtype=jnp.int32)

    # Table preparation hoisted off the call path: build once, reuse across calls.
    fused_table = jax.block_until_ready(build_fused_table(word_table, seg_table))

    out = joint_embeddings(x, segment_ids, fused_table)
    out = jax.block_until_ready(out)

    # pure-JAX reference (same semantics, including the buggy pos-embed broadcast)
    word_ref = word_table[x] * math.sqrt(D)
    pos_ref = x.astype(jnp.float32) + pe[:, :S]
    seg_ref = seg_table[segment_ids]
    ref = word_ref + pos_ref + seg_ref

    assert out.shape == ref.shape, (out.shape, ref.shape)
    assert jnp.allclose(out, ref, atol=1e-4, rtol=1e-4)
    print("KERNEL_OK")
</pallas_src>

<mosaic_0001>
module attributes {stable_mosaic.version = 11 : i64} {
  func.func @joint_embeddings_kernel(%arg0: memref<32x2xi32, #tpu.memory_space<vmem>>, %arg1: memref<128x32xf32, #tpu.memory_space<vmem>>, %arg2: memref<32x32xf32, #tpu.memory_space<vmem>>) attributes {dimension_semantics = [], scalar_prefetch = 0 : i64, scratch_operands = 0 : i64, tpu.core_type = #tpu.core_type<tc>} {
    %c0 = arith.constant 0 : index
    %c0_0 = arith.constant 0 : index
    %0 = vector.load %arg0[%c0, %c0_0] : memref<32x2xi32, #tpu.memory_space<vmem>>, vector<32x1xi32>
    %c0_1 = arith.constant 0 : index
    %c1 = arith.constant 1 : index
    %1 = vector.load %arg0[%c0_1, %c1] : memref<32x2xi32, #tpu.memory_space<vmem>>, vector<32x1xi32>
    %c64_i32 = arith.constant 64 : i32
    %2 = vector.broadcast %c64_i32 : i32 to vector<32x1xi32>
    %3 = arith.addi %1, %2 : vector<32x1xi32>
    %4 = tpu.iota {dimensions = array<i32: 1>} : vector<32x128xi32>
    %5 = vector.broadcast %0 : vector<32x1xi32> to vector<32x128xi32>
    %6 = arith.cmpi eq, %4, %5 : vector<32x128xi32>
    %7 = arith.extui %6 : vector<32x128xi1> to vector<32x128xi32>
    %8 = arith.sitofp %7 : vector<32x128xi32> to vector<32x128xf32>
    %9 = vector.broadcast %3 : vector<32x1xi32> to vector<32x128xi32>
    %10 = arith.cmpi eq, %4, %9 : vector<32x128xi32>
    %11 = arith.extui %10 : vector<32x128xi1> to vector<32x128xi32>
    %12 = arith.sitofp %11 : vector<32x128xi32> to vector<32x128xf32>
    %13 = arith.addf %8, %12 : vector<32x128xf32>
    %c0_2 = arith.constant 0 : index
    %c0_3 = arith.constant 0 : index
    %14 = vector.load %arg1[%c0_2, %c0_3] : memref<128x32xf32, #tpu.memory_space<vmem>>, vector<128x32xf32>
    %cst = arith.constant dense<0.000000e+00> : vector<32x32xf32>
    %15 = tpu.matmul %13, %14, %cst {dimension_numbers = #tpu.dot_dimension_numbers<[1], [0], [0], [1], [0, 0, 1, 1], [], []>, precision = #tpu.contract_precision<fp32>} : vector<32x128xf32>, vector<128x32xf32>, vector<32x32xf32> -> vector<32x32xf32>
    %16 = tpu.iota {dimensions = array<i32: 1>} : vector<1x128xi32>
    %17 = arith.sitofp %16 : vector<1x128xi32> to vector<1x128xf32>
    %cst_4 = arith.constant dense<0.000000e+00> : vector<1x32xf32>
    %18 = tpu.matmul %17, %8, %cst_4 {dimension_numbers = #tpu.dot_dimension_numbers<[1], [1], [0], [0], [0, 0, 1, 0], [], []>} : vector<1x128xf32>, vector<32x128xf32>, vector<1x32xf32> -> vector<1x32xf32>
    %19 = vector.broadcast %18 : vector<1x32xf32> to vector<32x32xf32>
    %20 = arith.addf %15, %19 : vector<32x32xf32>
    %c0_5 = arith.constant 0 : index
    %c0_6 = arith.constant 0 : index
    %21 = vector.load %arg2[%c0_5, %c0_6] : memref<32x32xf32, #tpu.memory_space<vmem>>, vector<32x32xf32>
    tpu.vector_store %arg2[%c0_5, %c0_6], %20 {strides = array<i32>} : memref<32x32xf32, #tpu.memory_space<vmem>>, vector<32x32xf32>,
    return
  }
}

</mosaic_0001>

<bundles_post_ra>
// kernel: tpu_custom_call.1
= control target key start
LH: loop header
LB: loop body
LE: loop exit
PB: predicated region body
PF: predicated region fallthrough
CT: control target
= control target key end

     0   :  { %v1366_v2 = vmov 0   ;;  %v1367_v10 = vmov 0.0   ;;  %s1917_s0 = inlined_call_operand.vmem [shape: s32[32,2], index: 0, kind: input, shape index: {}]   ;;  %s1918_s1 = inlined_call_operand.vmem [shape: f32[128,32], index: 1, kind: input, shape index: {}]   ;;  %s1919_s2 = inlined_call_operand.hbm [shape: f32[32,32], index: 2, kind: output, shape index: {}]  }
   0x1   :  { %v15_v0 = vld [vmem:[%s1917_s0 + $0x18] sm:$0xff]  ;;  %v13_v1 = vld [vmem:[%s1917_s0 + $0x8] sm:$0xff]  ;;  %1341 = vset.pattern.permute.xlu1 %v1366_v2  ;;  %1340 = vset.pattern.permute.xlu0 %v1366_v2  ;;  %v1403_v4 = vld [vmem:[%s1918_s1 + $0x70] sm:$0xff] }
   0x2   :  { %v1398_v3 = vld [vmem:[%s1918_s1 + $0x78] sm:$0xff]  ;;  %32 = vperm.xlu0 %1340, %v15_v0   ;;  %26 = vperm.xlu1 %1341, %v13_v1   ;;  %v1411_v6 = vld [vmem:[%s1918_s1 + $0x68] sm:$0xff]  ;;  %v14_v7 = vld [vmem:[%s1917_s0 + $0x10] sm:$0xff]  ;;  %v1420_v9 = vand.u32 4294901760, %v1403_v4 }
   0x3   :  { %v1406_v5 = vand.u32 4294901760, %v1398_v3  ;;  %v12_v8 = vld [vmem:[%s1917_s0] sm:$0xff]  ;;  %1093 = vmatprep.subr.mxu0 %v1367_v10  ;;  %v1426_v11 = vand.u32 4294901760, %v1411_v6 }
   0x5   :  { %1104 = vmatprep.subr.mxu1 %v1406_v5 }
   0x6   :  { %1105 = vmatpush3.msra.mxu1 %v1406_v5 }
   0x7   :  { %7 = vsyncpa [#allocation3], 0  ;;  %29 = vperm.xlu0 %1340, %v14_v7   ;;  %23 = vperm.xlu1 %1341, %v12_v8   ;;  %v1431_v12 = vld [vmem:[%s1918_s1 + $0x60] sm:$0xff]  ;;  %v17_v13 = vadd.s32 64, %v13_v1  ;;  %v16_v14 = vadd.s32 64, %v12_v8  ;;  %v1442_v16 = vld [vmem:[%s1918_s1 + $0x58] sm:$0xff]  ;;  %v1563_v43 = vsub.f32 %v1398_v3, %v1406_v5  ;;  %v1920_v44 = vlaneseq }
   0x8   :  { %1106 = vmatprep.subr.mxu1 %v1420_v9  ;;  %v1437_v15 = vand.u32 4294901760, %v1431_v12  ;;  %v1368_v17 = vmov 1   ;;  %v19_v18 = vadd.s32 64, %v15_v0  ;;  %v18_v19 = vadd.s32 64, %v14_v7  ;;  %v1447_v20 = vld [vmem:[%s1918_s1 + $0x50] sm:$0xff]  ;;  %v1457_v22 = vld [vmem:[%s1918_s1 + $0x48] sm:$0xff] }
   0x9   :  { %1107 = vmatpush3.msra.mxu1 %v1420_v9  ;;  %v1451_v21 = vand.u32 4294901760, %v1442_v16  ;;  %vm1369_vm0 = vmmov 0   ;;  %v1462_v23 = vand.u32 4294901760, %v1447_v20  ;;  %v1467_v24 = vld [vmem:[%s1918_s1 + $0x40] sm:$0xff]  ;;  %v1471_v25 = vand.u32 4294901760, %v1457_v22  ;;  %v1477_v26 = vld [vmem:[%s1918_s1 + $0x38] sm:$0xff] }
   0xa   :  { %1108 = vmatprep.subr.mxu1 %v1426_v11  ;;  %1101 = vmatprep.mubr.msk.f32.mxu0 %vm1369_vm0, %v1367_v10  ;;  %v1481_v27 = vand.u32 4294901760, %v1467_v24  ;;  %v1487_v28 = vld [vmem:[%s1918_s1 + $0x30] sm:$0xff]  ;;  %v1491_v29 = vand.u32 4294901760, %v1477_v26  ;;  %v1497_v30 = vld [vmem:[%s1918_s1 + $0x28] sm:$0xff]  ;;  %v1507_v32 = vld [vmem:[%s1918_s1 + $0x20] sm:$0xff]  ;;  %v21_v45 = vand.u32 127, %v1920_v44  ;;  %v1571_v48 = vsub.f32 %v1403_v4, %v1420_v9 }
   0xb   :  { %1342 = vset.pattern.permute.xlu0 %v1368_v17  ;;  %1343 = vset.pattern.permute.xlu1 %v1368_v17  ;;  %v1501_v31 = vand.u32 4294901760, %v1487_v28  ;;  %v1511_v33 = vand.u32 4294901760, %v1497_v30  ;;  %v1517_v34 = vld [vmem:[%s1918_s1 + $0x18] sm:$0xff]  ;;  %v1521_v35 = vand.u32 4294901760, %v1507_v32  ;;  %v1527_v36 = vld [vmem:[%s1918_s1 + $0x10] sm:$0xff]  ;;  %v1537_v38 = vld [vmem:[%s1918_s1 + $0x8] sm:$0xff]  ;;  %v1583_v54 = vsub.f32 %v1411_v6, %v1426_v11 }
   0xc   :  { %50 = vperm.xlu1 %1343, %v17_v13   ;;  %47 = vperm.xlu0 %1342, %v16_v14   ;;  %v1531_v37 = vand.u32 4294901760, %v1517_v34  ;;  %v1541_v39 = vand.u32 4294901760, %v1527_v36  ;;  %v1547_v40 = vld [vmem:[%s1918_s1] sm:$0xff]  ;;  %v1551_v41 = vand.u32 4294901760, %v1537_v38  ;;  %v1370_v49 = vmov 1.0   ;;  %s1371_s1 = smov [#allocation2]  }
   0xd   :  { %1109 = vmatpush3.msra.mxu1 %v1426_v11  ;;  %v1556_v42 = vand.u32 4294901760, %v1547_v40  ;;  %v1576_v50 = vand.u32 4294901760, %v1563_v43  ;;  %v1579_v53 = vand.u32 4294901760, %v1571_v48  ;;  %v1587_v55 = vsub.f32 %v1431_v12, %v1437_v15  ;;  %s945_s20 = sshll.u32 %s1371_s1, 4  ;;  %s946_s20 = int_to_ptr.vmem [resolvable:$true] %s945_s20 }
   0xe   :  { %1110 = vmatprep.subr.mxu1 %v1437_v15  ;;  %v1596_v58 = vand.u32 4294901760, %v1583_v54  ;;  %v1600_v59 = vsub.f32 %v1442_v16, %v1451_v21  ;;  %v1611_v1 = vsub.f32 %v1447_v20, %v1462_v23  ;;  %v90_v4 = vcvt.s32.f32 %v21_v45  ;;  %s1344_s21 = scalar_lea.vmem %s946_s20, 512  ;;  %p1349_p1 = scmp.lt.s32.totalorder %s946_s20, %s946_s20 }
   0xf   :  { %1111 = vmatpush3.msra.mxu1 %v1437_v15  ;;  %v290_v56 = vsub.f32 %v1563_v43, %v1576_v50  ;;  %v297_v57 = vsub.f32 %v1571_v48, %v1579_v53  ;;  %v1607_v0 = vand.u32 4294901760, %v1587_v55  ;;  %v1629_v20 = vsub.f32 %v1457_v22, %v1471_v25  ;;  %p1345_p0 = scmp.ne.s32.totalorder %s946_s20, %s1344_s21  ;;  %p1350_p2 = scmp.lt.s32.totalorder %s1344_s21, %s1344_s21 }
  0x10   :  { %53 = vperm.xlu1 %1343, %v18_v19   ;;  %56 = vperm.xlu0 %1342, %v19_v18   ;;  %v304_v13 = vsub.f32 %v1583_v54, %v1596_v58  ;;  %v1622_v18 = vand.u32 4294901760, %v1600_v59  ;;  %v1625_v19 = vand.u32 4294901760, %v1611_v1  ;;  %vm935_vm9 = vcmask 261120  }
  0x11   :  { %1112 = vmatprep.subr.mxu1 %v1451_v21  ;;  %v291_v6 = vand.u32 4294901760, %v290_v56  ;;  %v298_v12 = vand.u32 4294901760, %v297_v57  ;;  %v311_v17 = vsub.f32 %v1587_v55, %v1607_v0  ;;  %p1351_p3 = por %p1350_p2, %p1349_p1 }
  0x12   :  { %1113 = vmatpush3.msra.mxu1 %v1451_v21 }
  0x13   :  { %1114 = vmatprep.subr.mxu1 %v1462_v23  ;;  %p1352_p4 = pnand %p1351_p3, %p1345_p0 }
  0x14   :  { %1115 = vmatpush3.msra.mxu1 %v1462_v23 }
  0x15   :  { %1116 = vmatprep.subr.mxu1 %v1471_v25 }
  0x16   :  { %1117 = vmatpush3.msra.mxu1 %v1471_v25 }
  0x17   :  { %1118 = vmatprep.subr.mxu1 %v1481_v27 }
  0x18   :  { %1119 = vmatpush3.msra.mxu1 %v1481_v27 }
  0x19   :  { %1120 = vmatprep.subr.mxu1 %v1491_v29 }
  0x1a   :  { %1121 = vmatpush3.msra.mxu1 %v1491_v29 }
  0x1b   :  { %1122 = vmatprep.subr.mxu1 %v1501_v31 }
  0x1c   :  { %1123 = vmatpush3.msra.mxu1 %v1501_v31 }
  0x1d   :  { %1124 = vmatprep.subr.mxu1 %v1511_v33 }
  0x1e   :  { %1125 = vmatpush3.msra.mxu1 %v1511_v33 }
  0x1f   :  { %1126 = vmatprep.subr.mxu1 %v1521_v35 }
  0x20   :  { %1127 = vmatpush3.msra.mxu1 %v1521_v35 }
  0x21   :  { %1128 = vmatprep.subr.mxu1 %v1531_v37 }
  0x22   :  { %1129 = vmatpush3.msra.mxu1 %v1531_v37 }
  0x23   :  { %1130 = vmatprep.subr.mxu1 %v1541_v39 }
  0x24   :  { %1131 = vmatpush3.msra.mxu1 %v1541_v39 }
  0x25   :  { %1132 = vmatprep.subr.mxu1 %v1551_v41 }
  0x26   :  { %1133 = vmatpush3.msra.mxu1 %v1551_v41 }
  0x27   :  { %1134 = vmatprep.subr.mxu1 %v1556_v42 }
  0x28   :  { %1135 = vmatpush3.msra.mxu1 %v1556_v42 }
  0x29   :  { %1180 = vmatprep.subr.mxu1 %v1563_v43 }
  0x7d   :  { %v33_v46 = vpop.permute.xlu0 %32  ;;  %v27_v47 = vpop.permute.xlu1 %26 }
  0x7e   :  { %vm37_vm1 = vcmp.eq.s32.totalorder %v21_v45, %v33_v46  ;;  %vm35_vm3 = vcmp.eq.s32.totalorder %v21_v45, %v27_v47  ;;  %v318_v46 = vsub.f32 %v1600_v59, %v1622_v18 }
  0x7f   :  { %1094 = vmatpush3.xpose.msk.msra.mxu0 %vm37_vm1, %v1370_v49  ;;  %v957_v60 = vsel %vm35_vm3, 1.0, %v1367_v10  ;;  %v959_v57 = vsel %vm37_vm1, 1.0, %v1367_v10 }
  0x80   :  { %1095 = vmatprep.subr.mxu0 %v1367_v10 }
  0x82   :  { %v30_v51 = vpop.permute.xlu0 %29  ;;  %v24_v52 = vpop.permute.xlu1 %23 }
  0x83   :  { %vm36_vm2 = vcmp.eq.s32.totalorder %v21_v45, %v30_v51  ;;  %vm34_vm4 = vcmp.eq.s32.totalorder %v21_v45, %v24_v52 }
  0x84   :  { %1096 = vmatpush3.xpose.msk.msra.mxu0 %vm36_vm2, %v1370_v49  ;;  %v956_v61 = vsel %vm34_vm4, 1.0, %v1367_v10 }
  0x85   :  { %1097 = vmatprep.subr.mxu0 %v1367_v10 }
  0x87   :  { %v51_v62 = vpop.permute.xlu1 %50  ;;  %v48_v63 = vpop.permute.xlu0 %47 }
  0x88   :  { %vm59_vm5 = vcmp.eq.s32.totalorder %v21_v45, %v51_v62  ;;  %vm58_vm6 = vcmp.eq.s32.totalorder %v21_v45, %v48_v63  ;;  %1098 = vmatpush3.xpose.msk.msra.mxu0 %vm35_vm3, %v1370_v49 }
  0x89   :  { %v961_v2 = vsel %vm59_vm5, 1.0, %v1367_v10  ;;  %v960_v3 = vsel %vm58_vm6, 1.0, %v1367_v10  ;;  %1099 = vmatprep.subr.mxu0 %v1367_v10 }
  0x8a   :  { %v71_v7 = vadd.f32 %v961_v2, %v957_v60  ;;  %v70_v8 = vadd.f32 %v960_v3, %v956_v61  ;;  %v958_v60 = vsel %vm36_vm2, 1.0, %v1367_v10 }
  0x8b   :  { %v54_v14 = vpop.permute.xlu1 %53  ;;  %v57_v16 = vpop.permute.xlu0 %56 }
  0x8c   :  { %v1631_v47 = vand.u32 4294901760, %v71_v7  ;;  %v1633_v56 = vand.u32 4294901760, %v70_v8  ;;  %vm60_vm7 = vcmp.eq.s32.totalorder %v21_v45, %v54_v14  ;;  %vm61_vm8 = vcmp.eq.s32.totalorder %v21_v45, %v57_v16  ;;  %1100 = vmatpush3.xpose.msk.msra.mxu0 %vm34_vm4, %v1370_v49 }
  0x8d   :  { %v962_v61 = vsel %vm60_vm7, 1.0, %v1367_v10  ;;  %v963_v62 = vsel %vm61_vm8, 1.0, %v1367_v10  ;;  %1142 = vmatprep.subr.mxu0 %v291_v6  ;;  %v305_v49 = vand.u32 4294901760, %v304_v13  ;;  %v1651_v45 = vand.u32 4294901760, %v1629_v20 }
  0x8e   :  { %v1643_v22 = vsub.f32 %v71_v7, %v1631_v47  ;;  %v1646_v63 = vsub.f32 %v70_v8, %v1633_v56  ;;  %v72_v2 = vadd.f32 %v962_v61, %v958_v60  ;;  %v73_v52 = vadd.f32 %v963_v62, %v959_v57 }
  0x8f   :  { %1102 = vmatmul.mubr.f32.vlgmr.msra.gmra.mxu0 %v90_v4  ;;  %v1655_v10 = vsub.f32 %v1467_v24, %v1481_v27  ;;  %v312_v8 = vand.u32 4294901760, %v311_v17  ;;  %v325_v13 = vsub.f32 %v1611_v1, %v1625_v19  ;;  %v1668_v24 = vsub.f32 %v1477_v26, %v1491_v29 }
  0x90   :  { %v1657_v51 = vand.u32 4294901760, %v72_v2  ;;  %v1659_v3 = vand.u32 4294901760, %v73_v52  ;;  %1143 = vmatpush3.msra.mxu0 %v291_v6  ;;  %1174 = vmatprep.mubr.f32.mxu0 %v1633_v56  ;;  %v248_v4 = vand.u32 4294901760, %v1646_v63  ;;  %v1921_v7 = vand.u32 4294901760, %v1643_v22 }
  0x91   :  { %1144 = vmatprep.subr.mxu0 %v298_v12  ;;  %v319_v57 = vand.u32 4294901760, %v318_v46  ;;  %v332_v26 = vsub.f32 %v1629_v20, %v1651_v45  ;;  %v1685_v60 = vand.u32 4294901760, %v1655_v10  ;;  %v1689_v61 = vsub.f32 %v1487_v28, %v1501_v31 }
  0x92   :  { %v1671_v14 = vsub.f32 %v72_v2, %v1657_v51  ;;  %v1674_v6 = vsub.f32 %v73_v52, %v1659_v3  ;;  %1145 = vmatpush3.msra.mxu0 %v298_v12  ;;  %v249_v16 = vsub.f32 %v1646_v63, %v248_v4  ;;  %v259_v17 = vsub.f32 %v1643_v22, %v1921_v7 }
  0x93   :  { %1146 = vmatprep.subr.mxu0 %v305_v49  ;;  %v326_v44 = vand.u32 4294901760, %v325_v13  ;;  %v1694_v46 = vand.u32 4294901760, %v1668_v24  ;;  %v1698_v7 = vsub.f32 %v1497_v30, %v1511_v33  ;;  %v339_v13 = vsub.f32 %v1655_v10, %v1685_v60 }
  0x94   :  { %1147 = vmatpush3.msra.mxu0 %v305_v49  ;;  %v250_v12 = vand.u32 4294901760, %v249_v16  ;;  %v260_v62 = vand.u32 4294901760, %v259_v17  ;;  %v1923_v2 = vand.u32 4294901760, %v1671_v14  ;;  %v1922_v52 = vand.u32 4294901760, %v1674_v6 }
  0x95   :  { %1148 = vmatprep.subr.mxu0 %v312_v8  ;;  %v1709_v16 = vand.u32 4294901760, %v1689_v61  ;;  %v1713_v30 = vsub.f32 %v1507_v32, %v1521_v35  ;;  %v340_v32 = vand.u32 4294901760, %v339_v13  ;;  %v393_v13 = vsub.f32 %v1547_v40, %v1556_v42 }
  0x96   :  { %1136 = vmatprep.mubr.f32.mxu1 %v250_v12  ;;  %1149 = vmatpush3.msra.mxu0 %v312_v8  ;;  %v269_v28 = vsub.f32 %v1671_v14, %v1923_v2  ;;  %v279_v49 = vsub.f32 %v1674_v6, %v1922_v52  ;;  %v333_v12 = vand.u32 4294901760, %v332_v26  ;;  %v1720_v52 = vand.u32 4294901760, %v1698_v7 }
  0x97   :  { %1137 = vmatmul.mubr.f32.vlgmr.msra.gmra.mxu1 %v260_v62  ;;  %1150 = vmatprep.subr.mxu0 %v319_v57  ;;  %v346_v62 = vsub.f32 %v1668_v24, %v1694_v46  ;;  %v1724_v2 = vsub.f32 %v1517_v34, %v1531_v37  ;;  %v1735_v26 = vsub.f32 %v1527_v36, %v1541_v39 }
  0x98   :  { %1181 = vmatpush3.msra.mxu1 %v1563_v43  ;;  %1151 = vmatpush3.msra.mxu0 %v319_v57  ;;  %v270_v8 = vand.u32 4294901760, %v269_v28  ;;  %v280_v17 = vand.u32 4294901760, %v279_v49  ;;  %v353_v43 = vsub.f32 %v1689_v61, %v1709_v16  ;;  %v1731_v57 = vand.u32 4294901760, %v1713_v30 }
  0x99   :  { %1182 = vmatprep.subr.mxu1 %v1571_v48  ;;  %1152 = vmatprep.subr.mxu0 %v326_v44  ;;  %v347_v34 = vand.u32 4294901760, %v346_v62  ;;  %v1745_v28 = vsub.f32 %v1537_v38, %v1551_v41  ;;  %v1753_v49 = vand.u32 4294901760, %v1735_v26 }
  0x9a   :  { %1183 = vmatpush3.msra.mxu1 %v1571_v48  ;;  %1139 = vmatprep.mubr.f32.mxu1 %v270_v8  ;;  %v1741_v48 = vand.u32 4294901760, %v1724_v2  ;;  %v354_v36 = vand.u32 4294901760, %v353_v43 }
  0x9b   :  { %1153 = vmatpush3.msra.mxu0 %v326_v44  ;;  %1184 = vmatprep.subr.mxu1 %v1583_v54  ;;  %v360_v44 = vsub.f32 %v1698_v7, %v1720_v52  ;;  %v1762_v8 = vand.u32 4294901760, %v1745_v28 }
  0x9c   :  { %1140 = vmatmul.mubr.f32.gmra.mxu1 %v280_v17  ;;  %1154 = vmatprep.subr.mxu0 %v333_v12  ;;  %v381_v17 = vsub.f32 %v1735_v26, %v1753_v49 }
  0x9d   :  { %1185 = vmatpush3.msra.mxu1 %v1583_v54  ;;  %1155 = vmatpush3.msra.mxu0 %v333_v12  ;;  %v367_v54 = vsub.f32 %v1713_v30, %v1731_v57  ;;  %v361_v38 = vand.u32 4294901760, %v360_v44  ;;  %v1768_v12 = vand.u32 4294901760, %v393_v13  ;;  %v388_v62 = vsub.f32 %v1745_v28, %v1762_v8 }
  0x9e   :  { %1186 = vmatprep.subr.mxu1 %v1587_v55  ;;  %1212 = vmatprep.mubr.f32.mxu1 %v1646_v63 }
  0x9f   :  { %1156 = vmatprep.subr.mxu0 %v340_v32  ;;  %1187 = vmatpush3.msra.mxu1 %v1587_v55  ;;  %v374_v55 = vsub.f32 %v1724_v2, %v1741_v48  ;;  %v368_v40 = vand.u32 4294901760, %v367_v54 }
  0xa0   :  { %1157 = vmatpush3.msra.mxu0 %v340_v32  ;;  %1188 = vmatprep.subr.mxu1 %v1600_v59  ;;  %v395_v32 = vsub.f32 %v393_v13, %v1768_v12 }
  0xa1   :  { %1158 = vmatprep.subr.mxu0 %v347_v34  ;;  %1189 = vmatpush3.msra.mxu1 %v1600_v59  ;;  %v375_v59 = vand.u32 4294901760, %v374_v55 }
  0xa2   :  { %1159 = vmatpush3.msra.mxu0 %v347_v34  ;;  %1190 = vmatprep.subr.mxu1 %v1611_v1  ;;  %v396_v43 = vand.u32 4294901760, %v395_v32 }
  0xa3   :  { %1160 = vmatprep.subr.mxu0 %v354_v36  ;;  %1191 = vmatpush3.msra.mxu1 %v1611_v1  ;;  %v382_v1 = vand.u32 4294901760, %v381_v17 }
  0xa4   :  { %1161 = vmatpush3.msra.mxu0 %v354_v36  ;;  %1192 = vmatprep.subr.mxu1 %v1629_v20 }
  0xa5   :  { %1162 = vmatprep.subr.mxu0 %v361_v38  ;;  %1193 = vmatpush3.msra.mxu1 %v1629_v20  ;;  %v389_v20 = vand.u32 4294901760, %v388_v62 }
  0xa6   :  { %1163 = vmatpush3.msra.mxu0 %v361_v38  ;;  %1194 = vmatprep.subr.mxu1 %v1655_v10 }
  0xa7   :  { %1164 = vmatprep.subr.mxu0 %v368_v40  ;;  %1195 = vmatpush3.msra.mxu1 %v1655_v10 }
  0xa8   :  { %1165 = vmatpush3.msra.mxu0 %v368_v40  ;;  %1196 = vmatprep.subr.mxu1 %v1668_v24 }
  0xa9   :  { %1166 = vmatprep.subr.mxu0 %v375_v59  ;;  %1197 = vmatpush3.msra.mxu1 %v1668_v24 }
  0xaa   :  { %1167 = vmatpush3.msra.mxu0 %v375_v59  ;;  %1198 = vmatprep.subr.mxu1 %v1689_v61 }
  0xab   :  { %1168 = vmatprep.subr.mxu0 %v382_v1  ;;  %1199 = vmatpush3.msra.mxu1 %v1689_v61 }
  0xac   :  { %1169 = vmatpush3.msra.mxu0 %v382_v1  ;;  %1200 = vmatprep.subr.mxu1 %v1698_v7 }
  0xad   :  { %1170 = vmatprep.subr.mxu0 %v389_v20  ;;  %1201 = vmatpush3.msra.mxu1 %v1698_v7 }
  0xae   :  { %1171 = vmatpush3.msra.mxu0 %v389_v20  ;;  %1202 = vmatprep.subr.mxu1 %v1713_v30 }
  0xaf   :  { %1172 = vmatprep.subr.mxu0 %v396_v43  ;;  %1203 = vmatpush3.msra.mxu1 %v1713_v30 }
  0xb0   :  { %1173 = vmatpush3.msra.mxu0 %v396_v43  ;;  %1204 = vmatprep.subr.mxu1 %v1724_v2 }
  0xb1   :  { %1175 = vmatmul.mubr.f32.vlgmr.msra.gmra.mxu0 %v1631_v47  ;;  %1205 = vmatpush3.msra.mxu1 %v1724_v2 }
  0xb2   :  { %1218 = vmatprep.subr.mxu0 %v1406_v5  ;;  %1177 = vmatprep.mubr.f32.mxu0 %v1657_v51 }
  0xb3   :  { %1206 = vmatprep.subr.mxu1 %v1735_v26  ;;  %1219 = vmatpush3.msra.mxu0 %v1406_v5 }
  0xb4   :  { %1207 = vmatpush3.msra.mxu1 %v1735_v26  ;;  %1220 = vmatprep.subr.mxu0 %v1420_v9 }
  0xb5   :  { %1208 = vmatprep.subr.mxu1 %v1745_v28  ;;  %1221 = vmatpush3.msra.mxu0 %v1420_v9 }
  0xb6   :  { %1178 = vmatmul.mubr.f32.gmra.mxu0 %v1659_v3  ;;  %1209 = vmatpush3.msra.mxu1 %v1745_v28 }
  0xb7   :  { %1222 = vmatprep.subr.mxu0 %v1426_v11  ;;  %1210 = vmatprep.subr.mxu1 %v393_v13 }
  0xb8   :  { %1223 = vmatpush3.msra.mxu0 %v1426_v11  ;;  %1250 = vmatprep.mubr.f32.mxu0 %v248_v4 }
  0xb9   :  { %1211 = vmatpush3.msra.mxu1 %v393_v13  ;;  %1224 = vmatprep.subr.mxu0 %v1437_v15 }
  0xba   :  { %1213 = vmatmul.mubr.f32.vlgmr.msra.gmra.mxu1 %v1643_v22  ;;  %1225 = vmatpush3.msra.mxu0 %v1437_v15 }
  0xbb   :  { %1256 = vmatprep.subr.mxu1 %v1576_v50  ;;  %1215 = vmatprep.mubr.f32.mxu1 %v1671_v14 }
  0xbc   :  { %1226 = vmatprep.subr.mxu0 %v1451_v21  ;;  %1257 = vmatpush3.msra.mxu1 %v1576_v50  ;;  %v1924_v50 = vand.u32 4294901760, %v1643_v22 }
  0xbd   :  { %1227 = vmatpush3.msra.mxu0 %v1451_v21  ;;  %1258 = vmatprep.subr.mxu1 %v1579_v53 }
  0xbe   :  { %1228 = vmatprep.subr.mxu0 %v1462_v23  ;;  %1259 = vmatpush3.msra.mxu1 %v1579_v53  ;;  %v1925_v53 = vand.u32 4294901760, %v1671_v14 }
  0xbf   :  { %1216 = vmatmul.mubr.f32.gmra.mxu1 %v1674_v6  ;;  %1229 = vmatpush3.msra.mxu0 %v1462_v23 }
  0xc0   :  { %1260 = vmatprep.subr.mxu1 %v1596_v58  ;;  %1230 = vmatprep.subr.mxu0 %v1471_v25 }
  0xc1   :  { %1261 = vmatpush3.msra.mxu1 %v1596_v58  ;;  %1288 = vmatprep.mubr.f32.mxu1 %v1633_v56  ;;  %v1926_v58 = vand.u32 4294901760, %v1674_v6 }
  0xc2   :  { %1231 = vmatpush3.msra.mxu0 %v1471_v25  ;;  %1262 = vmatprep.subr.mxu1 %v1607_v0 }
  0xc3   :  { %1232 = vmatprep.subr.mxu0 %v1481_v27  ;;  %1263 = vmatpush3.msra.mxu1 %v1607_v0 }
  0xc4   :  { %1233 = vmatpush3.msra.mxu0 %v1481_v27  ;;  %1264 = vmatprep.subr.mxu1 %v1622_v18 }
  0xc5   :  { %1234 = vmatprep.subr.mxu0 %v1491_v29  ;;  %1265 = vmatpush3.msra.mxu1 %v1622_v18 }
  0xc6   :  { %1235 = vmatpush3.msra.mxu0 %v1491_v29  ;;  %1266 = vmatprep.subr.mxu1 %v1625_v19 }
  0xc7   :  { %1236 = vmatprep.subr.mxu0 %v1501_v31  ;;  %1267 = vmatpush3.msra.mxu1 %v1625_v19 }
  0xc8   :  { %1237 = vmatpush3.msra.mxu0 %v1501_v31  ;;  %1268 = vmatprep.subr.mxu1 %v1651_v45 }
  0xc9   :  { %1238 = vmatprep.subr.mxu0 %v1511_v33  ;;  %1269 = vmatpush3.msra.mxu1 %v1651_v45 }
  0xca   :  { %1239 = vmatpush3.msra.mxu0 %v1511_v33  ;;  %1270 = vmatprep.subr.mxu1 %v1685_v60 }
  0xcb   :  { %1240 = vmatprep.subr.mxu0 %v1521_v35  ;;  %1271 = vmatpush3.msra.mxu1 %v1685_v60 }
  0xcc   :  { %1241 = vmatpush3.msra.mxu0 %v1521_v35  ;;  %1272 = vmatprep.subr.mxu1 %v1694_v46 }
  0xcd   :  { %1242 = vmatprep.subr.mxu0 %v1531_v37  ;;  %1273 = vmatpush3.msra.mxu1 %v1694_v46 }
  0xce   :  { %1243 = vmatpush3.msra.mxu0 %v1531_v37  ;;  %1274 = vmatprep.subr.mxu1 %v1709_v16 }
  0xcf   :  { %1244 = vmatprep.subr.mxu0 %v1541_v39  ;;  %1275 = vmatpush3.msra.mxu1 %v1709_v16 }
  0xd0   :  { %1245 = vmatpush3.msra.mxu0 %v1541_v39  ;;  %1276 = vmatprep.subr.mxu1 %v1720_v52 }
  0xd1   :  { %1246 = vmatprep.subr.mxu0 %v1551_v41  ;;  %1277 = vmatpush3.msra.mxu1 %v1720_v52 }
  0xd2   :  { %1247 = vmatpush3.msra.mxu0 %v1551_v41  ;;  %1278 = vmatprep.subr.mxu1 %v1731_v57 }
  0xd3   :  { %1248 = vmatprep.subr.mxu0 %v1556_v42  ;;  %1279 = vmatpush3.msra.mxu1 %v1731_v57 }
  0xd4   :  { %1249 = vmatpush3.msra.mxu0 %v1556_v42  ;;  %1280 = vmatprep.subr.mxu1 %v1741_v48 }
  0xd5   :  { %1251 = vmatmul.mubr.f32.vlgmr.msra.gmra.mxu0 %v1924_v50  ;;  %1281 = vmatpush3.msra.mxu1 %v1741_v48 }
  0xd6   :  { %1294 = vmatprep.subr.mxu0 %v1406_v5  ;;  %1253 = vmatprep.mubr.f32.mxu0 %v1925_v53 }
  0xd7   :  { %1282 = vmatprep.subr.mxu1 %v1753_v49  ;;  %1295 = vmatpush3.msra.mxu0 %v1406_v5 }
  0xd8   :  { %1283 = vmatpush3.msra.mxu1 %v1753_v49  ;;  %1296 = vmatprep.subr.mxu0 %v1420_v9 }
  0xd9   :  { %1284 = vmatprep.subr.mxu1 %v1762_v8  ;;  %1297 = vmatpush3.msra.mxu0 %v1420_v9 }
  0xda   :  { %1254 = vmatmul.mubr.f32.gmra.mxu0 %v1926_v58  ;;  %1285 = vmatpush3.msra.mxu1 %v1762_v8 }
  0xdb   :  { %1298 = vmatprep.subr.mxu0 %v1426_v11  ;;  %1286 = vmatprep.subr.mxu1 %v1768_v12 }
  0xdc   :  { %1299 = vmatpush3.msra.mxu0 %v1426_v11  ;;  %1326 = vmatprep.mubr.f32.mxu0 %v1633_v56 }
  0xdd   :  { %1287 = vmatpush3.msra.mxu1 %v1768_v12  ;;  %1300 = vmatprep.subr.mxu0 %v1437_v15 }
  0xde   :  { %1289 = vmatmul.mubr.f32.vlgmr.msra.gmra.mxu1 %v1631_v47  ;;  %1301 = vmatpush3.msra.mxu0 %v1437_v15 }
  0xdf   :  { %1291 = vmatprep.mubr.f32.mxu1 %v1657_v51  ;;  %1302 = vmatprep.subr.mxu0 %v1451_v21 }
  0xe0   :  { %1303 = vmatpush3.msra.mxu0 %v1451_v21 }
  0xe1   :  { %1304 = vmatprep.subr.mxu0 %v1462_v23 }
  0xe2   :  { %1292 = vmatmul.mubr.f32.gmra.mxu1 %v1659_v3  ;;  %1305 = vmatpush3.msra.mxu0 %v1462_v23 }
  0xe3   :  { %1306 = vmatprep.subr.mxu0 %v1471_v25 }
  0xe4   :  { %1307 = vmatpush3.msra.mxu0 %v1471_v25 }
  0xe5   :  { %1308 = vmatprep.subr.mxu0 %v1481_v27 }
  0xe6   :  { %1309 = vmatpush3.msra.mxu0 %v1481_v27 }
  0xe7   :  { %1310 = vmatprep.subr.mxu0 %v1491_v29 }
  0xe8   :  { %1311 = vmatpush3.msra.mxu0 %v1491_v29 }
  0xe9   :  { %1312 = vmatprep.subr.mxu0 %v1501_v31 }
  0xea   :  { %1313 = vmatpush3.msra.mxu0 %v1501_v31 }
  0xeb   :  { %1314 = vmatprep.subr.mxu0 %v1511_v33 }
  0xec   :  { %1315 = vmatpush3.msra.mxu0 %v1511_v33 }
  0xed   :  { %1316 = vmatprep.subr.mxu0 %v1521_v35 }
  0xee   :  { %1317 = vmatpush3.msra.mxu0 %v1521_v35  ;;  %v1927_v35 = vlaneseq }
  0xef   :  { %1318 = vmatprep.subr.mxu0 %v1531_v37 }
  0xf0   :  { %1319 = vmatpush3.msra.mxu0 %v1531_v37  ;;  %v162_v37 = vshrl.u32 %v1927_v35, 7 }
  0xf1   :  { %1320 = vmatprep.subr.mxu0 %v1541_v39 }
  0xf2   :  { %1321 = vmatpush3.msra.mxu0 %v1541_v39 }
  0xf3   :  { %1322 = vmatprep.subr.mxu0 %v1551_v41 }
  0xf4   :  { %1323 = vmatpush3.msra.mxu0 %v1551_v41 }
  0xf5   :  { %1324 = vmatprep.subr.mxu0 %v1556_v42 }
  0xf6   :  { %1325 = vmatpush3.msra.mxu0 %v1556_v42  ;;  %v163_v42 = vsub.s32 0, %v162_v37 }
  0xf7   :  { %1327 = vmatmul.mubr.f32.vlgmr.msra.gmra.mxu0 %v1631_v47 }
  0xf8   :  { %1329 = vmatprep.mubr.f32.mxu0 %v1657_v51 }
  0xfb   :  { %1330 = vmatmul.mubr.f32.gmra.mxu0 %v1659_v3 }
 0x14f   :  { %v157_v5 = vpop.f32.mrf.mxu0 }
 0x150   :  { %v164_v19 = vrot.slane %v157_v5, %v163_v42 }
 0x151   :  { %v1103_v9 = vpop.f32.mrf.mxu0 }
 0x157   :  { %v1138_v11 = vpop.f32.mrf.mxu1 }
 0x158   :  { %v263_v22 = vadd.f32 %v1138_v11, %v164_v19 }
 0x159   :  { %v252_v15 = vpop.f32.mrf.mxu1 }
 0x15a   :  { %v253_v63 = vadd.f32 %v252_v15, %v164_v19 }
 0x15c   :  { %v1141_v21 = vpop.f32.mrf.mxu1 }
 0x15d   :  { %v283_v3 = vadd.f32 %v1141_v21, %v164_v19 }
 0x15e   :  { %v272_v25 = vpop.f32.mrf.mxu1 }
 0x15f   :  { %v273_v24 = vadd.f32 %v272_v25, %v164_v19 }
 0x171   :  { %v1176_v23 = vpop.f32.mrf.mxu0 }
 0x172   :  { %v440_v45 = vadd.f32 %v1176_v23, %v263_v22 }
 0x173   :  { %v433_v27 = vpop.f32.mrf.mxu0 }
 0x174   :  { %v434_v4 = vadd.f32 %v433_v27, %v253_v63 }
 0x176   :  { %v1179_v31 = vpop.f32.mrf.mxu0 }
 0x177   :  { %v452_v14 = vadd.f32 %v1179_v31, %v283_v3 }
 0x178   :  { %v445_v39 = vpop.f32.mrf.mxu0 }
 0x179   :  { %v446_v52 = vadd.f32 %v445_v39, %v273_v24 }
 0x17a   :  { %v1214_v29 = vpop.f32.mrf.mxu1 }
 0x17b   :  { %v563_v7 = vadd.f32 %v1214_v29, %v440_v45 }
 0x17c   :  { %v555_v33 = vpop.f32.mrf.mxu1 }
 0x17d   :  { %v556_v6 = vadd.f32 %v555_v33, %v434_v4 }
 0x17f   :  { %v1217_v41 = vpop.f32.mrf.mxu1 }
 0x180   :  { %v577_v46 = vadd.f32 %v1217_v41, %v452_v14 }
 0x181   :  { %v569_v18 = vpop.f32.mrf.mxu1 }
 0x182   :  { %v570_v26 = vadd.f32 %v569_v18, %v446_v52 }
 0x195   :  { %v1252_v0 = vpop.f32.mrf.mxu0 }
 0x196   :  { %v674_v60 = vadd.f32 %v1252_v0, %v563_v7 }
 0x197   :  { %v665_v47 = vpop.f32.mrf.mxu0 }
 0x198   :  { %v666_v16 = vadd.f32 %v665_v47, %v556_v6 }
 0x19a   :  { %v1255_v10 = vpop.f32.mrf.mxu0 }
 0x19b   :  { %v690_v34 = vadd.f32 %v1255_v10, %v577_v46 }
 0x19c   :  { %v681_v61 = vpop.f32.mrf.mxu0 }
 0x19d   :  { %v682_v54 = vadd.f32 %v681_v61, %v570_v26 }
 0x19e   :  { %v1290_v56 = vpop.f32.mrf.mxu1 }
 0x19f   :  { %v815_v30 = vadd.f32 %v1290_v56, %v674_v60 }
 0x1a0   :  { %v808_v51 = vpop.f32.mrf.mxu1 }
 0x1a1   :  { %v809_v44 = vadd.f32 %v808_v51, %v666_v16 }
 0x1a2   :  { %v1293_v2 = vpop.f32.mrf.mxu1 }
 0x1a3   :  { %v827_v49 = vadd.f32 %v1293_v2, %v690_v34 }
 0x1a4   :  { %v820_v28 = vpop.f32.mrf.mxu1 }
 0x1a5   :  { %v821_v55 = vadd.f32 %v820_v28, %v682_v54 }
 0x1b7   :  { %v1328_v57 = vpop.f32.mrf.mxu0 }
 0x1b8   :  { %v920_v48 = vadd.f32 %v1328_v57, %v815_v30 }
 0x1b9   :  { %v913_v36 = vpop.f32.mrf.mxu0 }
 0x1ba   :  { %937 = vst.msk [vmem:[#allocation2 + $0x8] sm:$0xff] %vm935_vm9, %v920_v48  ;;  %v914_v13 = vadd.f32 %v913_v36, %v809_v44 }
 0x1bb   :  { %v1331_v38 = vpop.f32.mrf.mxu0 }
 0x1bc   :  { %936 = vst.msk [vmem:[#allocation2] sm:$0xff] %vm935_vm9, %v914_v13  ;;  %v932_v8 = vadd.f32 %v1331_v38, %v827_v49 }
 0x1bd   :  { %v925_v40 = vpop.f32.mrf.mxu0 }
 0x1be   :  { %939 = vst.msk [vmem:[#allocation2 + $0x18] sm:$0xff] %vm935_vm9, %v932_v8  ;;  %v926_v17 = vadd.f32 %v925_v40, %v821_v55 }
 0x1c0   :  { %938 = vst.msk [vmem:[#allocation2 + $0x10] sm:$0xff] %vm935_vm9, %v926_v17 }
 0x1c1   :  { %1355 = shalt.err (!%p1352_p4)
}
 0x1c2   :  { %s1372_s22 = smov 128   ;;  %s1373_s23 = smov 8  }
 0x1c3   :  { %951 = dma.vmem_to_hbm [thread:$0]  %s946_s20, 512, %s1919_s2, [#allocation3], %s1372_s22, %s1372_s22, %s1373_s23  }
 0x1c4   :  { %1364 = dma.done.wait [#allocation3], 512  }
 0x1c5   :  { %1365 = vsyncadd [#allocation3], 4294966784 }
 0x1c6   :  { %955 = vsyncpa [#allocation3], 1 }

</bundles_post_ra>
